<compile_context>
chip_gen: v5e
topology: v5e:2x2
jax: 0.10.0
libtpu: 0.0.40
codegen_flags: <defaults>
</compile_context>

<pallas_src>
import jax
import jax.numpy as jnp
from jax.experimental import pallas as pl
from jax.experimental.pallas import tpu as pltpu


def _local_feature_add_kernel(stacked_ref, text_t_ref, out_ref):
    # stacked_ref: (1, 2N, D) — rows [0, N) are low, rows [N, 2N) are high
    # text_t_ref : (D, T)     — text features pre-transposed once in the wrapper
    # out_ref    : (1, N, D)
    n = out_ref.shape[1]

    feats = stacked_ref[0]          # (2N, D), native dtype feeds the MXU directly
    text_t = text_t_ref[...]        # (D, T)

    # ONE fused MXU matmul for both low and high similarities, f32 accumulate.
    sims = jnp.dot(feats, text_t, preferred_element_type=jnp.float32)   # (2N, T)

    # torch.var(dim=1, unbiased=False): population variance over the text axis.
    mean = jnp.mean(sims, axis=1, keepdims=True)
    dev = sims - mean
    var = jnp.mean(dev * dev, axis=1, keepdims=True)                    # (2N, 1)

    low_var = var[:n, :]            # (N, 1)
    high_var = var[n:, :]           # (N, 1)
    low0 = low_var[0:1, :]          # token-0 ("global") variance of low
    high0 = high_var[0:1, :]        # token-0 ("global") variance of high

    # (low_var/low0) / (high_var/high0) == (low_var*high0) / (high_var*low0)
    # -> single divide instead of three.
    enhance = jnp.maximum((low_var * high0) / (high_var * low0), 1.0)   # (N, 1) f32

    high = feats[n:, :]             # high rows, native dtype (promotes in the mul)
    out_ref[0] = (high * enhance).astype(out_ref.dtype)


def local_feature_add(low_features, high_features, text_features):
    B, N, D = low_features.shape
    T, Dt = text_features.shape
    assert Dt == D and high_features.shape == (B, N, D)

    # One-time XLA-side prep (NOT repeated per grid step inside the kernel):
    #   * stack low/high along the token axis -> single (B, 2N, D) MXU operand
    #   * transpose text once -> (D, T)
    stacked = jnp.concatenate([low_features, high_features], axis=1)    # (B, 2N, D)
    text_t = text_features.T                                            # (D, T)

    return pl.pallas_call(
        _local_feature_add_kernel,
        out_shape=jax.ShapeDtypeStruct((B, N, D), high_features.dtype),
        grid_spec=pltpu.PrefetchScalarGridSpec(
            num_scalar_prefetch=0,
            grid=(B,),
            in_specs=[
                pl.BlockSpec((1, 2 * N, D), lambda b: (b, 0, 0)),
                pl.BlockSpec((D, T), lambda b: (0, 0)),
            ],
            out_specs=pl.BlockSpec((1, N, D), lambda b: (b, 0, 0)),
        ),
        compiler_params=pltpu.CompilerParams(
            dimension_semantics=("parallel",),       # shard B across TCs (v7x)
            vmem_limit_bytes=64 * 1024 * 1024,       # beyond the 16/32 MiB scoped default
        ),
    )(stacked, text_t)


def _reference(low_features, high_features, text_features):
    B, N, D = low_features.shape

    def var_of(feats):
        flat = feats.reshape(-1, D)
        sims = flat @ text_features.T
        v = jnp.var(sims, axis=1)  # unbiased=False (population variance)
        return v.reshape(B, N)

    lv = var_of(low_features)
    hv = var_of(high_features)
    lr = lv / lv[:, 0:1]
    hr = hv / hv[:, 0:1]
    ratio = lr / hr
    enhance = jnp.maximum(ratio, 1.0)
    return high_features * enhance[:, :, None]


if __name__ == "__main__":
    B, N, D, T = 2, 8, 32, 8  # batch, tokens (incl. global token 0), feature_dim, text prompts
    key = jax.random.PRNGKey(0)
    k1, k2, k3 = jax.random.split(key, 3)
    low = jax.random.normal(k1, (B, N, D), dtype=jnp.float32)
    high = jax.random.normal(k2, (B, N, D), dtype=jnp.float32)
    text = jax.random.normal(k3, (T, D), dtype=jnp.float32)

    out = local_feature_add(low, high, text)
    out = jax.block_until_ready(out)

    ref = _reference(low, high, text)
    assert out.shape == (B, N, D)
    assert jnp.allclose(out, ref, atol=1e-4, rtol=1e-4), "mismatch vs reference"

    print("KERNEL_OK")
</pallas_src>

<mosaic_0001>
module attributes {stable_mosaic.version = 11 : i64} {
  func.func @_local_feature_add_kernel(%arg0: i32, %arg1: memref<1x16x32xf32, #tpu.memory_space<vmem>>, %arg2: memref<32x8xf32, #tpu.memory_space<vmem>>, %arg3: memref<1x8x32xf32, #tpu.memory_space<vmem>>) attributes {dimension_semantics = [#tpu.dimension_semantics<parallel>], iteration_bounds = array<i64: 2>, scalar_prefetch = 0 : i64, scratch_operands = 0 : i64, tpu.core_type = #tpu.core_type<tc>, window_params = [{transform_indices = @transform_0, window_bounds = array<i64: 1, 16, 32>}, {pipeline_mode = #tpu.pipeline_mode<synchronous>, transform_indices = @transform_1, window_bounds = array<i64: 32, 8>}, {transform_indices = @transform_2, window_bounds = array<i64: 1, 8, 32>}]} {
    %c0 = arith.constant 0 : index
    %c0_0 = arith.constant 0 : index
    %c0_1 = arith.constant 0 : index
    %0 = vector.load %arg1[%c0, %c0_0, %c0_1] : memref<1x16x32xf32, #tpu.memory_space<vmem>>, vector<1x16x32xf32>
    %1 = vector.shape_cast %0 : vector<1x16x32xf32> to vector<16x32xf32>
    %c0_2 = arith.constant 0 : index
    %c0_3 = arith.constant 0 : index
    %2 = vector.load %arg2[%c0_2, %c0_3] : memref<32x8xf32, #tpu.memory_space<vmem>>, vector<32x8xf32>
    %cst = arith.constant dense<0.000000e+00> : vector<16x8xf32>
    %3 = tpu.matmul %1, %2, %cst {dimension_numbers = #tpu.dot_dimension_numbers<[1], [0], [0], [1], [0, 0, 1, 1], [], []>} : vector<16x32xf32>, vector<32x8xf32>, vector<16x8xf32> -> vector<16x8xf32>
    %cst_4 = arith.constant dense<0.000000e+00> : vector<16xf32>
    %4 = vector.multi_reduction <add>, %3, %cst_4 [1] : vector<16x8xf32> to vector<16xf32>
    %5 = vector.shape_cast %4 : vector<16xf32> to vector<16x1xf32>
    %cst_5 = arith.constant 8.000000e+00 : f32
    %6 = vector.broadcast %cst_5 : f32 to vector<16x1xf32>
    %7 = arith.divf %5, %6 : vector<16x1xf32>
    %8 = vector.broadcast %7 : vector<16x1xf32> to vector<16x8xf32>
    %9 = arith.subf %3, %8 : vector<16x8xf32>
    %10 = arith.mulf %9, %9 : vector<16x8xf32>
    %cst_6 = arith.constant dense<0.000000e+00> : vector<16xf32>
    %11 = vector.multi_reduction <add>, %10, %cst_6 [1] : vector<16x8xf32> to vector<16xf32>
    %12 = vector.shape_cast %11 : vector<16xf32> to vector<16x1xf32>
    %cst_7 = arith.constant 8.000000e+00 : f32
    %13 = vector.broadcast %cst_7 : f32 to vector<16x1xf32>
    %14 = arith.divf %12, %13 : vector<16x1xf32>
    %15 = vector.extract_strided_slice %14 {offsets = [0, 0], sizes = [8, 1], strides = [1, 1]} : vector<16x1xf32> to vector<8x1xf32>
    %16 = vector.extract_strided_slice %14 {offsets = [8, 0], sizes = [8, 1], strides = [1, 1]} : vector<16x1xf32> to vector<8x1xf32>
    %17 = vector.extract_strided_slice %15 {offsets = [0, 0], sizes = [1, 1], strides = [1, 1]} : vector<8x1xf32> to vector<1x1xf32>
    %18 = vector.extract_strided_slice %16 {offsets = [0, 0], sizes = [1, 1], strides = [1, 1]} : vector<8x1xf32> to vector<1x1xf32>
    %19 = vector.broadcast %18 : vector<1x1xf32> to vector<8x1xf32>
    %20 = arith.mulf %15, %19 : vector<8x1xf32>
    %21 = vector.broadcast %17 : vector<1x1xf32> to vector<8x1xf32>
    %22 = arith.mulf %16, %21 : vector<8x1xf32>
    %23 = arith.divf %20, %22 : vector<8x1xf32>
    %cst_8 = arith.constant 1.000000e+00 : f32
    %24 = vector.broadcast %cst_8 : f32 to vector<8x1xf32>
    %25 = arith.maximumf %23, %24 : vector<8x1xf32>
    %26 = vector.extract_strided_slice %1 {offsets = [8, 0], sizes = [8, 32], strides = [1, 1]} : vector<16x32xf32> to vector<8x32xf32>
    %27 = vector.broadcast %25 : vector<8x1xf32> to vector<8x32xf32>
    %28 = arith.mulf %26, %27 : vector<8x32xf32>
    %c0_9 = arith.constant 0 : index
    %c0_10 = arith.constant 0 : index
    %c0_11 = arith.constant 0 : index
    %29 = vector.load %arg3[%c0_9, %c0_10, %c0_11] : memref<1x8x32xf32, #tpu.memory_space<vmem>>, vector<1x8x32xf32>
    %30 = vector.shape_cast %29 : vector<1x8x32xf32> to vector<8x32xf32>
    %31 = vector.shape_cast %28 : vector<8x32xf32> to vector<1x8x32xf32>
    tpu.vector_store %arg3[%c0_9, %c0_10, %c0_11], %31 {strides = array<i32>} : memref<1x8x32xf32, #tpu.memory_space<vmem>>, vector<1x8x32xf32>,
    return
  }
  func.func @transform_0(%arg0: i32) -> (i32, i32, i32) {
    %c0_i32 = arith.constant 0 : i32
    %c0_i32_0 = arith.constant 0 : i32
    %c0_i32_1 = arith.constant 0 : i32
    return %arg0, %c0_i32, %c0_i32_0 : i32, i32, i32
  }
  func.func @transform_1(%arg0: i32) -> (i32, i32) {
    %c0_i32 = arith.constant 0 : i32
    %c0_i32_0 = arith.constant 0 : i32
    %c0_i32_1 = arith.constant 0 : i32
    return %c0_i32, %c0_i32_0 : i32, i32
  }
  func.func @transform_2(%arg0: i32) -> (i32, i32, i32) {
    %c0_i32 = arith.constant 0 : i32
    %c0_i32_0 = arith.constant 0 : i32
    %c0_i32_1 = arith.constant 0 : i32
    return %arg0, %c0_i32, %c0_i32_0 : i32, i32, i32
  }
}

</mosaic_0001>

<bundles_post_ra>
// kernel: tpu_custom_call.1
= control target key start
LH: loop header
LB: loop body
LE: loop exit
PB: predicated region body
PF: predicated region fallthrough
CT: control target
= control target key end

     0   :  { %7 = vsyncpa [#allocation3], 0  ;;  %s553_s0 = inlined_call_operand.vmem [shape: f32[2,16,32], index: 0, kind: input, shape index: {}]   ;;  %s554_s1 = inlined_call_operand.vmem [shape: f32[32,8], index: 1, kind: input, shape index: {}]   ;;  %s555_s2 = inlined_call_operand.hbm [shape: f32[2,8,32], index: 2, kind: output, shape index: {}]  }
   0x1   :  { %9 = vsyncpa [#allocation3 + $0x1], 0  ;;  %s445_s9 = smov 0   ;;  %s447_s10 = smov 0  }
   0x2   :  { %s449_s11 = smov 0   ;;  %s451_s12 = smov 0  }
   0x3 LB: > { %s466_s13 = sadd.s32 4294967295, %s427_s12   ;;  %s303_s14 = sadd.s32 4294967294, %s427_s12   ;;  %s427_s12 = sphi %s451_s12, %s561_s12   ;;  %s423_s11 = sphi %s449_s11, %s560_s11   ;;  %s419_s10 = sphi %s447_s10, %s559_s10   ;;  %s415_s9 = sphi %s445_s9, %s558_s9  }
   0x4   : > { %s470_s15 = sadd.s32 1, %s427_s12   ;;  %s69_s16 = sadd.s32 1, %s423_s11 }
   0x5   : > { %s66_s17 = ssub.s32 %s427_s12, %s470_s15  ;;  %p79_p0 = scmp.ne.s32.totalorder %s423_s11, %s419_s10 }
   0x6   : > { %p67_p1 = scmp.eq.s32.totalorder %s66_s17, 0  ;;  %p80_p2 = scmp.eq.s32.totalorder %s466_s13, 1 }
   0x7   : > { %p85_p3 = scmp.ne.s32.totalorder %s419_s10, %s415_s9  ;;  %p86_p4 = scmp.eq.s32.totalorder %s303_s14, 1 }
   0x8   : > { %s481_s18 = scalar_select %p67_p1, %s423_s11, %s69_s16  }
   0x9   : > { %p483_p5 = por %p80_p2, %p79_p0  ;;  %p487_p6 = por %p86_p4, %p85_p3 }
   0xa   : > { %p306_p7 = scmp.ge.s32.totalorder %s427_s12, 1  ;;  %p115_p8 = scmp.lt.s32.totalorder %s427_s12, 3 }
   0xc   : > { %p116_p9 = pnand %p306_p7, %p115_p8 }
   0xd   : > { %p137_p10 = scmp.lt.s32.totalorder (!%p116_p9), %s466_s13, 1  ;;  %s134_s6 = sand.u32 (!%p116_p9), 1, %s419_s10  }
   0xe   : > { %119 = sbr.rel (%p116_p9) target bundleno = 431 (0x1af), region = 28  ;;  %s307_s7 = sshll.u32 (!%p116_p9), %s134_s6, 3 }
   0xf   : > { %s313_s8 = sshll.u32 (!%p116_p9), %s466_s13, 3  ;;  %s136_s21 = scalar_lea.vmem (!%p116_p9), [#allocation2], %s307_s7 }
  0x10   : > { %s239_s17 = scalar_lea.hbm (!%p116_p9), %s555_s2, %s313_s8  ;;  %s241_s22 = sshll.u32 (!%p116_p9), %s136_s21, 4  ;;  %s242_s22 = int_to_ptr.vmem [resolvable:$true] %s241_s22 }
  0x11   : > { %s243_s23 = sshll.u32 (!%p116_p9), %s239_s17, 4  ;;  %s385_s28 = scalar_lea.hbm (!%p116_p9), %s555_s2, 16  ;;  %s244_s23 = int_to_ptr.hbm [resolvable:$true] %s243_s23 }
  0x12   : > { %s379_s24 = sshra.s32 (!%p116_p9), %s244_s23, 4  ;;  %s380_s24 = int_to_ptr.hbm [resolvable:$true] %s379_s24 }
  0x13   : > { %v147_v0 = vld [vmem:[%s554_s1 + $0x18] sm:$0xff]  ;;  %v146_v1 = vld [vmem:[%s554_s1 + $0x10] sm:$0xff]  ;;  %v145_v2 = vld [vmem:[%s554_s1 + $0x8] sm:$0xff]  ;;  %s138_s27 = scalar_select %p137_p10, %s466_s13, 1  ;;  %vm148_vm0 = vcmask 261120   ;;  %vm178_vm1 = vcmask 64512  }
  0x14   : > { %167 = vmatpush.msra.mxu0 %v147_v0  ;;  %317 = vmatpush.msra.mxu1 %v147_v0  ;;  %v144_v3 = vld [vmem:[%s554_s1] sm:$0xff]  ;;  %v429_v10 = vmov 8.0   ;;  %s229_s13 = scalar_lea.sflag [#allocation3], %s134_s6  ;;  %s381_s25 = scalar_lea.hbm %s380_s24, 8 }
  0x15   : > { %s316_s30 = sshll.u32 %s138_s27, 4  ;;  %361 = vrcp.f32 %v429_v10  ;;  %p382_p11 = scmp.ne.s32.totalorder %s380_s24, %s381_s25 }
  0x16   : > { %168 = vmatpush.msra.mxu0 %v146_v1  ;;  %318 = vmatpush.msra.mxu1 %v146_v1  ;;  %s141_s5 = scalar_lea.vmem %s553_s0, %s316_s30  ;;  %p386_p0 = scmp.lt.s32.totalorder %s380_s24, %s555_s2 }
  0x17   : > { %v142_v4 = vld [vmem:[%s141_s5] sm:$0xff]  ;;  %v510_v5 = vld [vmem:[%s141_s5 + $0x8] sm:$0xff]  ;;  %p383_p12 = pnand %p382_p11, %p483_p5  ;;  %p387_p1 = scmp.lt.s32.totalorder %s385_s28, %s381_s25 }
  0x18   : > { %169 = vmatpush.msra.mxu0 %v145_v2  ;;  %319 = vmatpush.msra.mxu1 %v145_v2 }
  0x19   : > { %p384_p13 = pneg %p383_p12  ;;  %p388_p2 = por %p387_p1, %p386_p0 }
  0x1a   : > { %170 = vmatpush.msra.mxu0 %v144_v3  ;;  %320 = vmatpush.msra.mxu1 %v144_v3 }
  0x1b   : > { %310 = vmatmul.msk.f32.vlgmr.msra.gmra.mxu0 %vm148_vm0, %v142_v4  ;;  %311 = vmatmul.msk.f32.vlgmr.msra.gmra.mxu1 %vm148_vm0, %v510_v5  ;;  %v362_v11 = vpop.eup %361  ;;  %p389_p3 = pnand %p388_p2, %p384_p13 }
  0x1c   : > { %v186_v12 = vmul.f32 8.0, %v362_v11  ;;  %vm190_vm2 = vweird.f32 %v362_v11 }
  0x1e   : > { %v187_v13 = vsub.f32 1.0, %v186_v12 }
  0x20   : > { %v188_v14 = vmul.f32 %v362_v11, %v187_v13 }
  0x22   : > { %v189_v15 = vadd.f32 %v362_v11, %v188_v14 }
  0x24   : > { %v191_v16 = vsel %vm190_vm2, %v362_v11, %v189_v15 }
  0x98   : > { %v172_v6 = vpop.f32.mrf.mxu0  ;;  %v175_v8 = vpop.f32.mrf.mxu1 }
  0x99   : > { %v179_v7 = vsel %vm178_vm1, %v172_v6, 0.0  ;;  %v182_v9 = vsel %vm178_vm1, %v175_v8, 0.0 }
  0x9a   : > { %180 = vadd.xlane.f32.xlu0 %v179_v7 }
  0xa2   : > { %183 = vadd.xlane.f32.xlu0 %v182_v9 }
 0x10d   : > { %v181_v17 = vpop.xlane.xlu0 %180 }
 0x10e   : > { %v192_v18 = vmul.f32 %v191_v16, %v181_v17 }
 0x110   : > { %v194_v19 = vsub.f32 %v172_v6, %v192_v18 }
 0x112   : > { %v196_v20 = vmul.f32 %v194_v19, %v194_v19 }
 0x114   : > { %v198_v21 = vsel %vm178_vm1, %v196_v20, 0.0 }
 0x115   : > { %199 = vadd.xlane.f32.xlu1 %v198_v21  ;;  %v184_v22 = vpop.xlane.xlu0 %183 }
 0x116   : > { %v193_v23 = vmul.f32 %v191_v16, %v184_v22 }
 0x118   : > { %v195_v24 = vsub.f32 %v175_v8, %v193_v23 }
 0x11a   : > { %v197_v25 = vmul.f32 %v195_v24, %v195_v24 }
 0x11c   : > { %v201_v26 = vsel %vm178_vm1, %v197_v25, 0.0 }
 0x11d   : > { %202 = vadd.xlane.f32.xlu1 %v201_v26 }
 0x188   : > { %v200_v27 = vpop.xlane.xlu1 %199 }
 0x189   : > { %v204_v28 = vmul.f32 %v200_v27, %v191_v16 }
 0x18b   : > { %v208_v30 = vperm.slane %v204_v28, 0 }
 0x190   : > { %v203_v29 = vpop.xlane.xlu1 %202 }
 0x191   : > { %v205_v31 = vmul.f32 %v203_v29, %v191_v16 }
 0x193   : > { %v209_v32 = vmul.f32 %v208_v30, %v205_v31  ;;  %v206_v37 = vperm.slane %v205_v31, 0 }
 0x195   : > { %363 = vrcp.f32 %v209_v32  ;;  %v221_v36 = vand.u32 2147483648, %v209_v32  ;;  %v219_v39 = vand.u32 2147483647, %v209_v32  ;;  %vm215_vm4 = vweird.f32 %v209_v32 }
 0x196   : > { %v207_v42 = vmul.f32 %v206_v37, %v204_v28 }
 0x197   : > { %v222_v41 = vor.u32 1.1754944e-38, %v221_v36  ;;  %vm220_vm6 = vcmp.eq.f32.partialorder %v219_v39, 8.507059e+37 }
 0x19b   : > { %v364_v33 = vpop.eup %363 }
 0x19c   : > { %v211_v34 = vmul.f32 %v364_v33, %v209_v32  ;;  %vm216_vm3 = vweird.f32 %v364_v33 }
 0x19d   : > { %vm217_vm5 = vmor %vm215_vm4, %vm216_vm3 }
 0x19e   : > { %v212_v35 = vsub.f32 1.0, %v211_v34 }
 0x1a0   : > { %v213_v38 = vmul.f32 %v364_v33, %v212_v35 }
 0x1a2   : > { %v214_v40 = vadd.f32 %v364_v33, %v213_v38 }
 0x1a4   : > { %v218_v43 = vsel %vm217_vm5, %v364_v33, %v214_v40 }
 0x1a5   : > { %v223_v44 = vsel %vm220_vm6, %v222_v41, %v218_v43 }
 0x1a6   : > { %v224_v45 = vmul.f32 %v223_v44, %v207_v42 }
 0x1a8   : > { %v225_v46 = vmax.f32 %v224_v45, 1.0 }
 0x1aa   : > { %v226_v47 = vmul.f32 %v225_v46, %v510_v5 }
 0x1ac   : > { %227 = vst.msk [vmem:[%s136_s21] sm:$0xff] %vm148_vm0, %v226_v47 }
 0x1ad   : > { %392 = shalt.err (!%p389_p3)
}
 0x1ae   : > { %321 = dma.vmem_to_hbm [thread:$0]  (%p483_p5), %s242_s22, 128, %s244_s23, %s229_s13  }
 0x1af PF: > { %p327_p4 = scmp.ge.s32.totalorder %s427_s12, 2  ;;  %s255_s3 = sand.u32 1, %s415_s9  }
 0x1b0   : > { %s256_s4 = scalar_lea.sflag [#allocation3], %s255_s3 }
 0x1b1   : > { %p324_p7 = pnand %p327_p4, %p487_p6 }
 0x1b3   : > { %p325_p8 = pneg %p324_p7 }
 0x1b5   : > { %410 = dma.done.wait (%p325_p8), %s256_s4, 128  }
 0x1b6   : > { %412 = vsyncadd (%p325_p8), %s256_s4, 4294967168  ;;  %p12_p9 = scmp.ge.s32.totalorder %s470_s15, 4   ;;  %s558_s9 = smov %s419_s10 }
 0x1b7   : > { %s559_s10 = smov %s423_s11  ;;  %s560_s11 = smov %s481_s18 }
 0x1b8   : > { %s561_s12 = smov %s470_s15  ;;  %14 = sbr.rel (!%p12_p9) target bundleno = 3 (0x3), region = 63 }
 0x1bd   :  { %262 = vsyncpa [#allocation3], 1 }
 0x1be   :  { %264 = vsyncpa [#allocation3 + $0x1], 1 }

</bundles_post_ra>
